<compile_context>
chip_gen: v6e
topology: v6e:2x2x1
jax: 0.10.0
libtpu: 0.0.40
codegen_flags: <defaults>
</compile_context>

<pallas_src>
import functools
import math

import jax
import jax.numpy as jnp
from jax.experimental import pallas as pl
from jax.experimental.pallas import tpu as pltpu


def _build_pe_table(d_model: int, max_len: int) -> jnp.ndarray:
    """Deterministic sin/cos positional-encoding table, shape (max_len, d_model)."""
    position = jnp.arange(max_len, dtype=jnp.float32)[:, None]                 # (max_len, 1)
    div_term = jnp.exp(
        jnp.arange(0, d_model, 2, dtype=jnp.float32) * (-math.log(10000.0) / d_model)
    )                                                                          # (d_model/2,)
    pe = jnp.zeros((max_len, d_model), dtype=jnp.float32)
    pe = pe.at[:, 0::2].set(jnp.sin(position * div_term))
    pe = pe.at[:, 1::2].set(jnp.cos(position * div_term))
    return pe


def _pe_add_kernel(x_ref, pe_ref, o_ref, *, batch: int, d_model: int):
    # Eval mode / p == 0: x tile is (ts, B*D), pe tile is (ts, D).
    # Broadcast pe across the batch with static, lane-aligned slices
    # (d_model = 512 -> every slice is a multiple of 128 lanes -> unmasked vst).
    pe_tile = pe_ref[...]                                   # read once per grid step
    for j in range(batch):                                  # static unroll
        sl = slice(j * d_model, (j + 1) * d_model)
        o_ref[:, sl] = x_ref[:, sl] + pe_tile


def _pe_add_dropout_kernel(x_ref, pe_ref, keep_ref, o_ref, *,
                           batch: int, d_model: int, scale: float):
    # Training mode: add + inverted dropout. keep_ref holds a {0, 1} mask in
    # x.dtype (generated in the wrapper with jax.random -> portable lowering).
    pe_tile = pe_ref[...]
    for j in range(batch):
        sl = slice(j * d_model, (j + 1) * d_model)
        y = x_ref[:, sl] + pe_tile
        o_ref[:, sl] = y * keep_ref[:, sl] * jnp.asarray(scale, y.dtype)


def _cdiv(a: int, b: int) -> int:
    return -(-a // b)


def _round_up(n: int, m: int) -> int:
    return _cdiv(n, m) * m


def _pick_seq_tile(S: int, row_bytes: int, itemsize: int,
                   target_bytes: int = 4 << 20) -> int:
    """Dtype-aware sequence tile: multiple of the sublane packing, ~4 MiB per
    operand tile, and small enough to keep >=2 grid steps when S allows it."""
    row_mult = max(8, 32 // max(int(itemsize), 1))          # 8 f32, 16 bf16, 32 int8/fp8
    if S <= row_mult:
        return S                                            # block == full dim (always legal)
    budget_rows = max(row_mult,
                      (target_bytes // max(row_bytes, 1)) // row_mult * row_mult)
    half_rows = _round_up(_cdiv(S, 2), row_mult)            # >=2 steps -> both v7x TCs in flight
    ts = min(budget_rows, half_rows)
    return max(row_mult, (ts // row_mult) * row_mult)


def positional_encoding(x, pe, *, p: float = 0.1, train: bool = False,
                        rng_key=None, seq_tile: int | None = None):
    """x: (S, B, D); pe: (max_len, D) with max_len >= S. Returns (S, B, D)."""
    S, B, D = x.shape
    BD = B * D
    dtype = x.dtype
    assert pe.shape[0] >= S and pe.shape[1] == D

    use_dropout = bool(train) and p > 0.0
    if use_dropout and p >= 1.0:
        # nn.Dropout(p=1.0) zeroes the whole tensor.
        return jnp.zeros_like(x)

    # Lane-dense presentation: (S, B, D) -> (S, B*D) (free, contiguous reshape).
    # pe stays as the tiny (S, D) table -- no (S, B*D) materialization in HBM.
    x2 = x.reshape(S, BD)
    pe_s = pe[:S].astype(dtype)

    itemsize = jnp.dtype(dtype).itemsize
    row_bytes = BD * itemsize
    ts = _pick_seq_tile(S, row_bytes, itemsize) if seq_tile is None else seq_tile
    grid = (_cdiv(S, ts),)                                   # tail block padded/masked by Pallas

    cparams = pltpu.CompilerParams(
        dimension_semantics=("parallel",),                   # independent steps -> megacore
        vmem_limit_bytes=32 * 1024 * 1024,                   # safe on v5e/v6e/v7x
    )
    out_shape = jax.ShapeDtypeStruct((S, BD), dtype)

    x_spec = pl.BlockSpec((ts, BD), lambda i: (i, 0))
    pe_spec = pl.BlockSpec((ts, D), lambda i: (i, 0))
    o_spec = pl.BlockSpec((ts, BD), lambda i: (i, 0))

    if not use_dropout:
        kernel = functools.partial(_pe_add_kernel, batch=B, d_model=D)
        out2 = pl.pallas_call(
            kernel,
            out_shape=out_shape,
            grid=grid,
            in_specs=[x_spec, pe_spec],
            out_specs=o_spec,
            compiler_params=cparams,
        )(x2, pe_s)
    else:
        if rng_key is None:
            rng_key = jax.random.PRNGKey(0)
        keep = jax.random.bernoulli(rng_key, 1.0 - p, (S, BD)).astype(dtype)
        scale = 1.0 / (1.0 - p)
        kernel = functools.partial(_pe_add_dropout_kernel, batch=B, d_model=D, scale=scale)
        out2 = pl.pallas_call(
            kernel,
            out_shape=out_shape,
            grid=grid,
            in_specs=[x_spec, pe_spec, x_spec],              # keep mask shares x's block spec
            out_specs=o_spec,
            compiler_params=cparams,
        )(x2, pe_s, keep)

    return out2.reshape(S, B, D)


if __name__ == "__main__":
    # Small shapes consistent with the module: d_model=512 (as in
    # PositionalEncoding(512, max_len=100)), short sequence, small batch.
    D = 512
    B = 2
    S = 32
    MAX_LEN = 40
    P = 0.1

    key = jax.random.PRNGKey(0)
    kx, kd = jax.random.split(key)
    x = jax.random.normal(kx, (S, B, D), dtype=jnp.float32)
    pe = _build_pe_table(D, MAX_LEN)   # deterministic buffer, like register_buffer('pe', ...)

    # --- Eval-mode forward (dropout is identity): deterministic, check vs reference.
    out_eval = jax.block_until_ready(positional_encoding(x, pe, p=P, train=False))
    ref = x + pe[:S][:, None, :]
    assert out_eval.shape == (S, B, D)
    assert jnp.allclose(out_eval, ref, atol=1e-5, rtol=1e-5), "eval mismatch vs reference"

    # --- Non-divisible sequence length: exercises the cdiv grid / padded tail block.
    S2 = 20
    x_odd = jax.random.normal(kx, (S2, B, D), dtype=jnp.float32)
    out_odd = jax.block_until_ready(positional_encoding(x_odd, pe, p=P, train=False))
    ref_odd = x_odd + pe[:S2][:, None, :]
    assert jnp.allclose(out_odd, ref_odd, atol=1e-5, rtol=1e-5), "tail-block mismatch"

    # --- Training-mode forward: exercise the dropout path. Every element must be
    # either exactly 0 (dropped) or (x+pe)/(1-p) (kept), with keep-rate ~ 1-p.
    out_train = jax.block_until_ready(
        positional_encoding(x, pe, p=P, train=True, rng_key=kd))
    scaled = ref / (1.0 - P)
    dropped = out_train == 0.0
    matches = jnp.abs(out_train - scaled) <= (1e-4 + 1e-4 * jnp.abs(scaled))
    assert bool(jnp.all(dropped | matches)), "dropout kept values mis-scaled"
    keep_frac = float(1.0 - jnp.mean(dropped.astype(jnp.float32)))
    assert 0.75 <= keep_frac <= 0.99, f"unexpected keep fraction {keep_frac}"

    # --- p = 1.0 edge case matches nn.Dropout(p=1): all zeros.
    out_p1 = jax.block_until_ready(positional_encoding(x, pe, p=1.0, train=True, rng_key=kd))
    assert bool(jnp.all(out_p1 == 0.0)), "p=1 dropout must zero everything"

    print("KERNEL_OK")
</pallas_src>

<mosaic_0001>
module attributes {stable_mosaic.version = 11 : i64} {
  func.func @_pe_add_kernel(%arg0: i32, %arg1: memref<16x1024xf32, #tpu.memory_space<vmem>>, %arg2: memref<16x512xf32, #tpu.memory_space<vmem>>, %arg3: memref<16x1024xf32, #tpu.memory_space<vmem>>) attributes {dimension_semantics = [#tpu.dimension_semantics<parallel>], iteration_bounds = array<i64: 2>, scalar_prefetch = 0 : i64, scratch_operands = 0 : i64, tpu.core_type = #tpu.core_type<tc>, window_params = [{transform_indices = @transform_0, window_bounds = array<i64: 16, 1024>}, {transform_indices = @transform_1, window_bounds = array<i64: 16, 512>}, {transform_indices = @transform_2, window_bounds = array<i64: 16, 1024>}]} {
    %c0 = arith.constant 0 : index
    %c0_0 = arith.constant 0 : index
    %0 = vector.load %arg2[%c0, %c0_0] : memref<16x512xf32, #tpu.memory_space<vmem>>, vector<16x512xf32>
    %c0_1 = arith.constant 0 : index
    %c0_2 = arith.constant 0 : index
    %1 = vector.load %arg1[%c0_1, %c0_2] : memref<16x1024xf32, #tpu.memory_space<vmem>>, vector<16x512xf32>
    %2 = arith.addf %1, %0 : vector<16x512xf32>
    %c0_3 = arith.constant 0 : index
    %c0_4 = arith.constant 0 : index
    %3 = vector.load %arg3[%c0_3, %c0_4] : memref<16x1024xf32, #tpu.memory_space<vmem>>, vector<16x512xf32>
    tpu.vector_store %arg3[%c0_3, %c0_4], %2 {strides = array<i32>} : memref<16x1024xf32, #tpu.memory_space<vmem>>, vector<16x512xf32>,
    %c0_5 = arith.constant 0 : index
    %c512 = arith.constant 512 : index
    %4 = vector.load %arg1[%c0_5, %c512] : memref<16x1024xf32, #tpu.memory_space<vmem>>, vector<16x512xf32>
    %5 = arith.addf %4, %0 : vector<16x512xf32>
    %c0_6 = arith.constant 0 : index
    %c512_7 = arith.constant 512 : index
    %6 = vector.load %arg3[%c0_6, %c512_7] : memref<16x1024xf32, #tpu.memory_space<vmem>>, vector<16x512xf32>
    tpu.vector_store %arg3[%c0_6, %c512_7], %5 {strides = array<i32>} : memref<16x1024xf32, #tpu.memory_space<vmem>>, vector<16x512xf32>,
    return
  }
  func.func @transform_0(%arg0: i32) -> (i32, i32) {
    %c0_i32 = arith.constant 0 : i32
    %c0_i32_0 = arith.constant 0 : i32
    return %arg0, %c0_i32 : i32, i32
  }
  func.func @transform_1(%arg0: i32) -> (i32, i32) {
    %c0_i32 = arith.constant 0 : i32
    %c0_i32_0 = arith.constant 0 : i32
    return %arg0, %c0_i32 : i32, i32
  }
  func.func @transform_2(%arg0: i32) -> (i32, i32) {
    %c0_i32 = arith.constant 0 : i32
    %c0_i32_0 = arith.constant 0 : i32
    return %arg0, %c0_i32 : i32, i32
  }
}

</mosaic_0001>

<bundles_post_ra>
// kernel: tpu_custom_call.1
= control target key start
LH: loop header
LB: loop body
LE: loop exit
PB: predicated region body
PF: predicated region fallthrough
CT: control target
= control target key end

     0   :  { %7 = vsyncpa [#allocation3], 0  ;;  %s854_s0 = inlined_call_operand.hbm [shape: f32[32,1024], index: 0, kind: input, shape index: {}]   ;;  %s855_s1 = inlined_call_operand.hbm [shape: f32[32,512], index: 1, kind: input, shape index: {}]   ;;  %s856_s2 = inlined_call_operand.hbm [shape: f32[32,1024], index: 2, kind: output, shape index: {}]  }
   0x1   :  { %9 = vsyncpa [#allocation3 + $0x1], 0 }
   0x2   :  { %10 = vsyncpa [#allocation6], 0 }
   0x3   :  { %12 = vsyncpa [#allocation6 + $0x1], 0 }
   0x4   :  { %13 = vsyncpa [#allocation4], 0 }
   0x5   :  { %15 = vsyncpa [#allocation4 + $0x1], 0  ;;  %s608_s9 = smov 0   ;;  %s610_s10 = smov 0  }
   0x6   :  { %s612_s11 = smov 0   ;;  %s614_s12 = smov 0  }
   0x7 LB: > { %s629_s13 = sadd.s32 4294967295, %s582_s12   ;;  %s374_s14 = sadd.s32 4294967294, %s582_s12   ;;  %s582_s12 = sphi %s614_s12, %s872_s12   ;;  %s578_s11 = sphi %s612_s11, %s871_s11   ;;  %s574_s10 = sphi %s610_s10, %s870_s10   ;;  %s570_s9 = sphi %s608_s9, %s869_s9  }
   0x8   : > { %s633_s15 = sadd.s32 1, %s582_s12   ;;  %s28_s16 = sadd.s32 1, %s578_s11 }
   0x9   : > { %s25_s17 = ssub.s32 %s582_s12, %s633_s15  ;;  %p35_p0 = scmp.ne.s32.totalorder %s578_s11, %s574_s10 }
   0xa   : > { %p26_p1 = scmp.eq.s32.totalorder %s25_s17, 0  ;;  %p36_p2 = scmp.eq.s32.totalorder %s582_s12, 0 }
   0xb   : > { %p41_p3 = scmp.ne.s32.totalorder %s574_s10, %s570_s9  ;;  %p42_p4 = scmp.eq.s32.totalorder %s629_s13, 0 }
   0xc   : > { %s645_s18 = scalar_select %p26_p1, %s578_s11, %s28_s16  }
   0xd   : > { %p647_p5 = por %p36_p2, %p35_p0  ;;  %p651_p6 = por %p42_p4, %p41_p3 }
   0xe   : > { %p91_p7 = scmp.eq.s32.totalorder %s629_s13, 1  ;;  %p97_p8 = scmp.eq.s32.totalorder %s374_s14, 1 }
   0xf   : > { %s860_s20 = scalar_select %p651_p6, 1, 0 }
  0x10   : > { %p418_p10 = scmp.lt.s32.totalorder %s582_s12, 2  ;;  %p658_p11 = por %p91_p7, %p35_p0 }
  0x11   : > { %p662_p12 = por %p97_p8, %p41_p3  ;;  %s667_s23 = sand.u32 1, %s578_s11  }
  0x12   : > { %s861_s21 = scalar_select %p658_p11, 1, 0 }
  0x13   : > { %s862_s22 = scalar_select %p662_p12, 1, 0 }
  0x14   : > { %s396_s24 = sshll.u32 %s582_s12, 11  ;;  %s377_s25 = sshll.u32 %s667_s23, 7 }
  0x15   : > { %s674_s28 = scalar_lea.hbm %s854_s0, %s396_s24  ;;  %s121_s29 = scalar_lea.vmem [#allocation2], %s377_s25 }
  0x16   : > { %s129_s30 = sshll.u32 %s121_s29, 4  ;;  %p678_p13 = pnand %p418_p10, %p647_p5  ;;  %s682_s30 = int_to_ptr.vmem [resolvable:$true] %s129_s30 }
  0x17   : > { %s118_s4 = scalar_lea.sflag [#allocation3], %s667_s23  ;;  %s458_s5 = scalar_lea.hbm %s674_s28, 2048 }
  0x18   : > { %p459_p0 = scmp.ne.s32.totalorder %s674_s28, %s458_s5  ;;  %p460_p1 = pneg %p678_p13 }
  0x19   : > { %s463_s8 = scalar_lea.hbm %s854_s0, 4096  ;;  %p464_p4 = scmp.lt.s32.totalorder %s674_s28, %s854_s0 }
  0x1a   : > { %p461_p2 = pnand %p460_p1, %p459_p0  ;;  %p465_p5 = scmp.lt.s32.totalorder %s463_s8, %s458_s5 }
  0x1c   : > { %p462_p3 = pneg %p461_p2  ;;  %p466_p7 = por %p465_p5, %p464_p4 }
  0x1e   : > { %p467_p8 = pnand %p466_p7, %p462_p3 }
  0x20   : > { %470 = shalt.err (!%p467_p8)
}
  0x21   : > { %s471_s17 = scalar_lea.vmem %s682_s30, 2048  ;;  %s584_s19 = smov [#allocation2]  }
  0x22   : > { %p472_p10 = scmp.ne.s32.totalorder %s682_s30, %s471_s17  ;;  %s476_s24 = sshll.u32 %s584_s19, 4  ;;  %s477_s24 = int_to_ptr.vmem [resolvable:$false] %s476_s24 }
  0x23   : > { %s478_s25 = scalar_lea.vmem %s477_s24, 4096  ;;  %p479_p9 = scmp.lt.s32.totalorder %s682_s30, %s477_s24 }
  0x24   : > { %p474_p0 = pnand %p472_p10, %p460_p1  ;;  %p480_p12 = scmp.lt.s32.totalorder %s478_s25, %s471_s17 }
  0x26   : > { %p475_p2 = pneg %p474_p0  ;;  %p481_p11 = por %p480_p12, %p479_p9 }
  0x28   : > { %p482_p4 = pnand %p481_p11, %p475_p2 }
  0x2a   : > { %485 = shalt.err (!%p482_p4)
}
  0x2b   : > { %s585_s26 = smov 1024   ;;  %s586_s27 = smov 64  }
  0x2c   : > { %410 = dma.hbm_to_vmem [thread:$0]  (!%p678_p13), %s674_s28, 2048, %s682_s30, %s118_s4, %s585_s26, %s585_s26, %s586_s27  }
  0x2d   : > { %p385_p3 = scmp.ge.s32.totalorder %s582_s12, 1  ;;  %p159_p5 = scmp.lt.s32.totalorder %s582_s12, 3 }
  0x2e   : > { %s381_s29 = sshll.u32 %s667_s23, 6  ;;  %s398_s6 = sshll.u32 %s582_s12, 10 }
  0x2f   : > { %p714_p9 = pnand %p385_p3, %p159_p5  ;;  %s143_s7 = scalar_lea.vmem [#allocation5], %s381_s29 }
  0x30   : > { %s151_s8 = sshll.u32 %s143_s7, 4  ;;  %s722_s17 = scalar_lea.hbm %s855_s1, %s398_s6  ;;  %s724_s8 = int_to_ptr.vmem [resolvable:$true] %s151_s8 }
  0x31   : > { %s140_s28 = scalar_lea.sflag [#allocation6], %s667_s23  ;;  %s486_s30 = scalar_lea.hbm %s722_s17, 1024 }
  0x32   : > { %p487_p11 = scmp.ne.s32.totalorder %s722_s17, %s486_s30  ;;  %s491_s24 = scalar_lea.hbm %s855_s1, 2048 }
  0x33   : > { %p492_p8 = scmp.lt.s32.totalorder %s722_s17, %s855_s1  ;;  %p493_p10 = scmp.lt.s32.totalorder %s491_s24, %s486_s30 }
  0x34   : > { %p489_p12 = pnand %p487_p11, %p460_p1 }
  0x35   : > { %p494_p0 = por %p493_p10, %p492_p8 }
  0x36   : > { %p490_p7 = pneg %p489_p12 }
  0x38   : > { %p495_p2 = pnand %p494_p0, %p490_p7 }
  0x3a   : > { %498 = shalt.err (!%p495_p2)
}
  0x3b   : > { %s499_s27 = scalar_lea.vmem %s724_s8, 1024  ;;  %s587_s29 = smov [#allocation5]  }
  0x3c   : > { %p500_p4 = scmp.ne.s32.totalorder %s724_s8, %s499_s27  ;;  %s504_s6 = sshll.u32 %s587_s29, 4  ;;  %s505_s6 = int_to_ptr.vmem [resolvable:$false] %s504_s6 }
  0x3d   : > { %s506_s7 = scalar_lea.vmem %s505_s6, 2048  ;;  %p507_p11 = scmp.lt.s32.totalorder %s724_s8, %s505_s6 }
  0x3e   : > { %p502_p3 = pnand %p500_p4, %p460_p1  ;;  %p508_p12 = scmp.lt.s32.totalorder %s506_s7, %s499_s27 }
  0x40   : > { %p503_p5 = pneg %p502_p3  ;;  %p509_p6 = por %p508_p12, %p507_p11 }
  0x42   : > { %p510_p8 = pnand %p509_p6, %p503_p5 }
  0x44   : > { %513 = shalt.err (!%p510_p8)
}
  0x45   : > { %s588_s14 = smov 512   ;;  %s589_s16 = smov 32  }
  0x46   : > { %413 = dma.hbm_to_vmem [thread:$0]  (!%p678_p13), %s722_s17, 1024, %s724_s8, %s140_s28, %s588_s14, %s588_s14, %s589_s16  }
  0x47   : > { %163 = sbr.rel (%p714_p9) target bundleno = 107 (0x6b), region = 28  ;;  %s754_s30 = sand.u32 (!%p714_p9), 1, %s574_s10  }
  0x48   : > { %s386_s4 = sshll.u32 (!%p714_p9), %s754_s30, 7  ;;  %s166_s19 = scalar_lea.sflag (!%p714_p9), [#allocation3], %s754_s30 }
  0x49   : > { %s758_s24 = scalar_lea.vmem (!%p714_p9), [#allocation2], %s386_s4  ;;  %p865_p6 = scmp.ne.s32.totalorder (!%p714_p9), %s860_s20, 0 }
  0x4c   : > { %557 = dma.done.wait (%p865_p6), %s166_s19, 2048  }
  0x4d   : > { %559 = vsyncadd (%p865_p6), %s166_s19, 4294965248  ;;  %s387_s23 = sshll.u32 %s754_s30, 6  ;;  %s175_s3 = scalar_lea.sflag [#allocation6], %s754_s30 }
  0x4e   : > { %s178_s5 = scalar_lea.vmem [#allocation5], %s387_s23 }
  0x4f   : > { %561 = dma.done.wait (%p865_p6), %s175_s3, 1024  }
  0x50   : > { %563 = vsyncadd (%p865_p6), %s175_s3, 4294966272  ;;  %v207_v0 = vld [vmem:[%s178_s5] sm:$0xff]  ;;  %v208_v2 = vld [vmem:[%s178_s5 + $0x8] sm:$0xff]  ;;  %s774_s20 = scalar_lea.vmem [#allocation7], %s386_s4  ;;  %s400_s8 = sshll.u32 %s629_s13, 11 }
  0x51   : > { %v215_v1 = vld [vmem:[%s758_s24] sm:$0xff]  ;;  %v216_v4 = vld [vmem:[%s758_s24 + $0x8] sm:$0xff]  ;;  %v209_v5 = vld [vmem:[%s178_s5 + $0x10] sm:$0xff]  ;;  %s278_s17 = sshll.u32 %s774_s20, 4  ;;  %s800_s25 = scalar_lea.hbm %s856_s2, %s400_s8  ;;  %s802_s17 = int_to_ptr.vmem [resolvable:$true] %s278_s17 }
  0x52   : > { %v223_v3 = vadd.f32 %v215_v1, %v207_v0  ;;  %v217_v6 = vld [vmem:[%s758_s24 + $0x10] sm:$0xff]  ;;  %v224_v7 = vadd.f32 %v216_v4, %v208_v2  ;;  %v210_v9 = vld [vmem:[%s178_s5 + $0x18] sm:$0xff]  ;;  %v211_v11 = vld [vmem:[%s178_s5 + $0x20] sm:$0xff]  ;;  %s264_s26 = scalar_lea.sflag [#allocation4], %s754_s30  ;;  %s514_s27 = scalar_lea.vmem %s802_s17, 2048 }
  0x53   : > { %v225_v8 = vadd.f32 %v217_v6, %v209_v5  ;;  %v218_v10 = vld [vmem:[%s758_s24 + $0x18] sm:$0xff]  ;;  %v219_v13 = vld [vmem:[%s758_s24 + $0x40] sm:$0xff]  ;;  %v212_v14 = vld [vmem:[%s178_s5 + $0x28] sm:$0xff]  ;;  %p515_p13 = scmp.ne.s32.totalorder %s802_s17, %s514_s27  ;;  %p866_p1 = scmp.ne.s32.totalorder %s861_s21, 0 }
  0x54   : > { %231 = vst [vmem:[%s774_s20] sm:$0xff] %v223_v3  ;;  %v226_v12 = vadd.f32 %v218_v10, %v210_v9  ;;  %v220_v15 = vld [vmem:[%s758_s24 + $0x48] sm:$0xff]  ;;  %232 = vst [vmem:[%s774_s20 + $0x8] sm:$0xff] %v224_v7  ;;  %v227_v16 = vadd.f32 %v219_v13, %v211_v11  ;;  %v213_v18 = vld [vmem:[%s178_s5 + $0x30] sm:$0xff]  ;;  %s590_s29 = smov [#allocation7]  }
  0x55   : > { %233 = vst [vmem:[%s774_s20 + $0x10] sm:$0xff] %v225_v8  ;;  %v228_v17 = vadd.f32 %v220_v15, %v212_v14  ;;  %v221_v19 = vld [vmem:[%s758_s24 + $0x50] sm:$0xff]  ;;  %v214_v20 = vld [vmem:[%s178_s5 + $0x38] sm:$0xff]  ;;  %v239_v23 = vld [vmem:[%s758_s24 + $0x20] sm:$0xff]  ;;  %p516_p9 = pnand %p515_p13, %p866_p1  ;;  %s518_s6 = sshll.u32 %s590_s29, 4  ;;  %s519_s6 = int_to_ptr.vmem [resolvable:$false] %s518_s6 }
  0x56   : > { %234 = vst [vmem:[%s774_s20 + $0x18] sm:$0xff] %v226_v12  ;;  %v229_v21 = vadd.f32 %v221_v19, %v213_v18  ;;  %v222_v22 = vld [vmem:[%s758_s24 + $0x58] sm:$0xff]  ;;  %v240_v24 = vld [vmem:[%s758_s24 + $0x28] sm:$0xff]  ;;  %235 = vst [vmem:[%s774_s20 + $0x40] sm:$0xff] %v227_v16  ;;  %v247_v26 = vadd.f32 %v239_v23, %v207_v0  ;;  %s520_s7 = scalar_lea.vmem %s519_s6, 4096  ;;  %p521_p10 = scmp.lt.s32.totalorder %s802_s17, %s519_s6 }
  0x57   : > { %236 = vst [vmem:[%s774_s20 + $0x48] sm:$0xff] %v228_v17  ;;  %v230_v25 = vadd.f32 %v222_v22, %v214_v20  ;;  %v248_v27 = vadd.f32 %v240_v24, %v208_v2  ;;  %v241_v28 = vld [vmem:[%s758_s24 + $0x30] sm:$0xff]  ;;  %v242_v29 = vld [vmem:[%s758_s24 + $0x38] sm:$0xff]  ;;  %v243_v30 = vld [vmem:[%s758_s24 + $0x60] sm:$0xff]  ;;  %p517_p7 = pneg %p516_p9  ;;  %p522_p0 = scmp.lt.s32.totalorder %s520_s7, %s514_s27 }
  0x58   : > { %237 = vst [vmem:[%s774_s20 + $0x50] sm:$0xff] %v229_v21  ;;  %v249_v31 = vadd.f32 %v241_v28, %v209_v5  ;;  %v250_v32 = vadd.f32 %v242_v29, %v210_v9  ;;  %v251_v33 = vadd.f32 %v243_v30, %v211_v11  ;;  %v244_v34 = vld [vmem:[%s758_s24 + $0x68] sm:$0xff]  ;;  %v245_v35 = vld [vmem:[%s758_s24 + $0x70] sm:$0xff]  ;;  %v246_v36 = vld [vmem:[%s758_s24 + $0x78] sm:$0xff] }
  0x59   : > { %238 = vst [vmem:[%s774_s20 + $0x58] sm:$0xff] %v230_v25  ;;  %255 = vst [vmem:[%s774_s20 + $0x20] sm:$0xff] %v247_v26  ;;  %v252_v37 = vadd.f32 %v244_v34, %v212_v14  ;;  %v253_v38 = vadd.f32 %v245_v35, %v213_v18  ;;  %v254_v39 = vadd.f32 %v246_v36, %v214_v20  ;;  %p523_p2 = por %p522_p0, %p521_p10 }
  0x5a   : > { %256 = vst [vmem:[%s774_s20 + $0x28] sm:$0xff] %v248_v27  ;;  %257 = vst [vmem:[%s774_s20 + $0x30] sm:$0xff] %v249_v31 }
  0x5b   : > { %258 = vst [vmem:[%s774_s20 + $0x38] sm:$0xff] %v250_v32  ;;  %259 = vst [vmem:[%s774_s20 + $0x60] sm:$0xff] %v251_v33  ;;  %p524_p4 = pnand %p523_p2, %p517_p7 }
  0x5c   : > { %260 = vst [vmem:[%s774_s20 + $0x68] sm:$0xff] %v252_v37  ;;  %261 = vst [vmem:[%s774_s20 + $0x70] sm:$0xff] %v253_v38 }
  0x5d   : > { %262 = vst [vmem:[%s774_s20 + $0x78] sm:$0xff] %v254_v39 }
  0x5e   : > { %527 = shalt.err (!%p524_p4)
}
  0x5f   : > { %s528_s14 = scalar_lea.hbm %s800_s25, 2048  ;;  %s532_s19 = scalar_lea.hbm %s856_s2, 4096 }
  0x60   : > { %p529_p3 = scmp.ne.s32.totalorder %s800_s25, %s528_s14  ;;  %p533_p12 = scmp.lt.s32.totalorder %s800_s25, %s856_s2 }
  0x61   : > { %p534_p8 = scmp.lt.s32.totalorder %s532_s19, %s528_s14 }
  0x62   : > { %p530_p5 = pnand %p529_p3, %p866_p1 }
  0x63   : > { %p535_p6 = por %p534_p8, %p533_p12 }
  0x64   : > { %p531_p11 = pneg %p530_p5 }
  0x66   : > { %p536_p13 = pnand %p535_p6, %p531_p11 }
  0x68   : > { %539 = shalt.err (!%p536_p13)
}
  0x69   : > { %s591_s3 = smov 1024   ;;  %s592_s5 = smov 64  }
  0x6a   : > { %405 = dma.vmem_to_hbm [thread:$0]  (%p866_p1), %s802_s17, 2048, %s800_s25, %s264_s26, %s591_s3, %s591_s3, %s592_s5  }
  0x6b PF: > { %s293_s20 = sand.u32 1, %s570_s9   ;;  %p867_p9 = scmp.ne.s32.totalorder %s862_s22, 0 }
  0x6c   : > { %p868_p7 = scmp.ge.s32.totalorder %s582_s12, 2  ;;  %s294_s8 = scalar_lea.sflag [#allocation4], %s293_s20 }
  0x6e   : > { %p415_p10 = pnand %p868_p7, %p867_p9 }
  0x70   : > { %p416_p0 = pneg %p415_p10 }
  0x72   : > { %565 = dma.done.wait (%p416_p0), %s294_s8, 2048  }
  0x73   : > { %567 = vsyncadd (%p416_p0), %s294_s8, 4294965248  ;;  %p18_p2 = scmp.ge.s32.totalorder %s633_s15, 4   ;;  %s869_s9 = smov %s574_s10 }
  0x74   : > { %s870_s10 = smov %s578_s11  ;;  %s871_s11 = smov %s645_s18 }
  0x75   : > { %s872_s12 = smov %s633_s15  ;;  %20 = sbr.rel (!%p18_p2) target bundleno = 7 (0x7), region = 86 }
  0x7a   :  { %299 = vsyncpa [#allocation3], 1 }
  0x7b   :  { %301 = vsyncpa [#allocation3 + $0x1], 1 }
  0x7c   :  { %302 = vsyncpa [#allocation6], 1 }
  0x7d   :  { %304 = vsyncpa [#allocation6 + $0x1], 1 }
  0x7e   :  { %305 = vsyncpa [#allocation4], 1 }
  0x7f   :  { %307 = vsyncpa [#allocation4 + $0x1], 1 }

</bundles_post_ra>
